<compile_context>
chip_gen: v5e
topology: v5e:2x2
jax: 0.10.0
libtpu: 0.0.40
codegen_flags: <defaults>
</compile_context>

<pallas_src>
import functools

import jax
import jax.numpy as jnp
from jax.experimental import pallas as pl
from jax.experimental.pallas import tpu as pltpu


def _round_up(x, m):
    return ((x + m - 1) // m) * m


def _vmem_limit_bytes():
    """Per-generation scoped-VMEM budget (~3/4 of physical capacity)."""
    phys = 64 * 1024 * 1024  # conservative fallback (v7x physical VMEM)
    try:
        info = pltpu.get_tpu_info()
        cap = getattr(info, "vmem_capacity_bytes", None)
        if cap:
            phys = int(cap)
    except Exception:
        pass
    return max(32 * 1024 * 1024, (phys * 3) // 4)


def _choose_tiles(n):
    """Return (padded_n, tile_n, tile_k)."""
    if n <= 512:
        np_ = _round_up(n, 256)        # >= 2 row tiles so both v7x cores get work
        return np_, np_ // 2, np_
    np_ = _round_up(n, 512)            # bound padding waste of the O(N^2) stream
    if np_ <= 2048:
        tile_k = np_                   # single K pass
    elif np_ % 2048 == 0:
        tile_k = 2048
    elif np_ % 1024 == 0:
        tile_k = 1024
    else:
        tile_k = 512
    return np_, 512, tile_k


def _pad2(w, rows, cols):
    r, c = w.shape
    if r == rows and c == cols:
        return w
    return jnp.zeros((rows, cols), w.dtype).at[:r, :c].set(w)


def sage_agg_kernel(a_ref, xwl_ref, root_ref, o_ref, acc_ref, *, relu, tile_k,
                    xwl_resident):
    # a_ref:    (tile_n, tile_k) bf16  block of row-normalized adjacency
    # xwl_ref:  (Np, Fp) or (tile_k, Fp) bf16  hoisted neighbor transform h @ Wl^T
    # root_ref: (tile_n, Fp)     f32   hoisted self transform h @ Wr^T + b
    # o_ref:    (tile_n, Fp)     f32/bf16 output rows
    # acc_ref:  (tile_n, Fp)     f32   VMEM accumulator over the K axis
    k = pl.program_id(1)

    @pl.when(k == 0)
    def _():
        acc_ref[...] = jnp.zeros_like(acc_ref)

    if xwl_resident:
        start = pl.multiple_of(k * tile_k, tile_k)
        xwl_blk = xwl_ref[pl.ds(start, tile_k), :]
    else:
        xwl_blk = xwl_ref[...]

    acc_ref[...] += jnp.dot(a_ref[...], xwl_blk,
                            preferred_element_type=jnp.float32)

    @pl.when(k == pl.num_programs(1) - 1)
    def _():
        out = acc_ref[...] + root_ref[...]          # f32 epilogue
        if relu:
            out = jnp.maximum(out, 0.0)
        o_ref[...] = out.astype(o_ref.dtype)


def sage_aggregate_pallas(a_bf16, xwl_bf16, root, *, relu, tile_n, tile_k,
                          out_dtype, vmem_limit):
    Np = a_bf16.shape[0]
    Fp = xwl_bf16.shape[1]
    assert Np % tile_n == 0 and Np % tile_k == 0 and Fp % 128 == 0

    # Hold xWl fully VMEM-resident when it fits comfortably; otherwise stream
    # it K-blocked (and pay the per-row-tile re-read).
    xwl_bytes = Np * Fp * 2
    xwl_resident = xwl_bytes <= vmem_limit // 4
    if xwl_resident:
        xwl_spec = pl.BlockSpec((Np, Fp), lambda i, k: (0, 0))
        xwl_traffic = xwl_bytes
    else:
        xwl_spec = pl.BlockSpec((tile_k, Fp), lambda i, k: (k, 0))
        xwl_traffic = (Np // tile_n) * Np * Fp * 2

    kernel = functools.partial(sage_agg_kernel, relu=relu, tile_k=tile_k,
                               xwl_resident=xwl_resident)

    out_bytes = jnp.dtype(out_dtype).itemsize
    flops = 2 * Np * Np * Fp
    bytes_accessed = (Np * Np * 2            # A stream (bf16), dominant
                      + xwl_traffic          # xWl
                      + Np * Fp * 4          # root (f32)
                      + Np * Fp * out_bytes) # output

    return pl.pallas_call(
        kernel,
        out_shape=jax.ShapeDtypeStruct((Np, Fp), out_dtype),
        grid_spec=pltpu.PrefetchScalarGridSpec(
            num_scalar_prefetch=0,
            grid=(Np // tile_n, Np // tile_k),
            in_specs=[
                pl.BlockSpec((tile_n, tile_k), lambda i, k: (i, k)),  # A block
                xwl_spec,                                              # xWl
                pl.BlockSpec((tile_n, Fp), lambda i, k: (i, 0)),       # root rows
            ],
            out_specs=pl.BlockSpec((tile_n, Fp), lambda i, k: (i, 0)),
            scratch_shapes=[pltpu.VMEM((tile_n, Fp), jnp.float32)],
        ),
        compiler_params=pltpu.CompilerParams(
            dimension_semantics=("parallel", "arbitrary"),
            vmem_limit_bytes=vmem_limit,
        ),
        cost_estimate=pl.CostEstimate(flops=flops, transcendentals=0,
                                      bytes_accessed=bytes_accessed),
    )(a_bf16, xwl_bf16, root)


def glorot(key, fan_in, fan_out):
    limit = jnp.sqrt(6.0 / (fan_in + fan_out))
    return jax.random.uniform(key, (fan_in, fan_out), jnp.float32,
                              minval=-limit, maxval=limit)


def init_sage_params(key, in_channels, hidden_channels, out_channels, num_layers):
    dims = [in_channels] + [hidden_channels] * (num_layers - 1) + [out_channels]
    params = []
    for layer in range(num_layers):
        fin, fout = dims[layer], dims[layer + 1]
        key, k1, k2 = jax.random.split(key, 3)
        wl_t = glorot(k1, fin, fout)            # lin_l.weight^T (with bias)
        wr_t = glorot(k2, fin, fout)            # lin_r.weight^T (no bias)
        b = jnp.zeros((1, fout), jnp.float32)   # lin_l.bias
        params.append((wl_t, wr_t, b))
    return params


def sage_forward(x, a_norm, params):
    N, fin0 = x.shape
    Np, tile_n, tile_k = _choose_tiles(N)
    vmem_limit = _vmem_limit_bytes()

    # Cast to bf16 BEFORE padding: avoids an Np^2 f32 HBM temporary.  Padded A
    # columns are zero, so padded nodes never contaminate real rows; padded
    # rows are sliced off at the end.
    a_bf16 = (jnp.zeros((Np, Np), jnp.bfloat16)
              .at[:N, :N].set(a_norm.astype(jnp.bfloat16)))
    h = jnp.zeros((Np, fin0), jnp.float32).at[:N, :].set(x)

    n_layers = len(params)
    out_channels = params[-1][0].shape[1]
    for layer, (wl_t, wr_t, b) in enumerate(params):
        is_last = layer == n_layers - 1
        fout = wl_t.shape[1]
        fout_pad = _round_up(fout, 128)        # lane-dense outputs / full MXU width
        fin_h = h.shape[1]                     # may already be feature-padded
        wl_p = _pad2(wl_t, fin_h, fout_pad)    # zero pad rows/cols
        wr_p = _pad2(wr_t, fin_h, fout_pad)
        b_p = _pad2(b, 1, fout_pad)            # zero-padded bias

        # Hoisted, grid-invariant weight transforms (plain XLA, once per layer).
        xwl = (h @ wl_p).astype(jnp.bfloat16)              # neighbor MXU operand
        root = (h @ wr_p).astype(jnp.float32) + b_p        # self transform + bias

        out_dtype = jnp.float32 if is_last else jnp.bfloat16
        h = sage_aggregate_pallas(a_bf16, xwl, root, relu=not is_last,
                                  tile_n=tile_n, tile_k=tile_k,
                                  out_dtype=out_dtype, vmem_limit=vmem_limit)
        # F.dropout(..., training=False) -> identity
    return h[:N, :out_channels]


def sage_forward_ref(x, a_norm, params, *, cast_bf16):
    """Pure-JAX reference.  cast_bf16=True mirrors the kernel's bf16 operands
    and bf16 inter-layer activations."""
    n_layers = len(params)
    a = a_norm.astype(jnp.bfloat16) if cast_bf16 else a_norm
    h = x
    for layer, (wl_t, wr_t, b) in enumerate(params):
        is_last = layer == n_layers - 1
        xwl = h @ wl_t
        if cast_bf16:
            xwl = xwl.astype(jnp.bfloat16)
        agg = jnp.dot(a, xwl, preferred_element_type=jnp.float32)
        out = agg + ((h @ wr_t).astype(jnp.float32) + b)
        if not is_last:
            out = jnp.maximum(out, 0.0)
            if cast_bf16:
                out = out.astype(jnp.bfloat16)
        h = out
    return h.astype(jnp.float32)


if __name__ == "__main__":
    # Small synthetic graph: N nodes, dense adjacency.
    N = 128
    in_channels, hidden_channels, out_channels = 32, 32, 16
    num_layers = 3
    dropout = 0.5  # eval mode -> identity

    key = jax.random.PRNGKey(0)
    key, kx, ka, kp = jax.random.split(key, 4)

    x = jax.random.normal(kx, (N, in_channels), jnp.float32)
    # Random directed adjacency (~10% density); adj_t row i lists in-neighbors of i.
    adj = (jax.random.uniform(ka, (N, N)) < 0.1).astype(jnp.float32)
    deg = jnp.sum(adj, axis=1, keepdims=True)
    a_norm = adj / jnp.maximum(deg, 1.0)  # row-normalized -> mean aggregation

    params = init_sage_params(kp, in_channels, hidden_channels, out_channels,
                              num_layers)

    out = jax.block_until_ready(sage_forward(x, a_norm, params))
    assert out.shape == (N, out_channels)

    # Exact-ish path check (same bf16 operands / intermediates as the kernel).
    ref_bf16 = sage_forward_ref(x, a_norm, params, cast_bf16=True)
    assert jnp.allclose(out, ref_bf16, atol=5e-3, rtol=5e-3)

    # Loose check vs full-f32 semantics of the original module.
    ref_f32 = sage_forward_ref(x, a_norm, params, cast_bf16=False)
    assert jnp.allclose(out, ref_f32, atol=5e-2, rtol=5e-2)

    print("KERNEL_OK")
</pallas_src>

<mosaic_0001>
module attributes {stable_mosaic.version = 11 : i64} {
  func.func @sage_agg_kernel(%arg0: i32, %arg1: i32, %arg2: memref<128x256xbf16, #tpu.memory_space<vmem>>, %arg3: memref<256x128xbf16, #tpu.memory_space<vmem>>, %arg4: memref<128x128xf32, #tpu.memory_space<vmem>>, %arg5: memref<128x128xbf16, #tpu.memory_space<vmem>>, %arg6: memref<128x128xf32, #tpu.memory_space<vmem>>) attributes {dimension_semantics = [#tpu.dimension_semantics<parallel>, #tpu.dimension_semantics<arbitrary>], iteration_bounds = array<i64: 2, 1>, scalar_prefetch = 0 : i64, scratch_operands = 1 : i64, tpu.core_type = #tpu.core_type<tc>, window_params = [{transform_indices = @transform_0, window_bounds = array<i64: 128, 256>}, {pipeline_mode = #tpu.pipeline_mode<synchronous>, transform_indices = @transform_1, window_bounds = array<i64: 256, 128>}, {transform_indices = @transform_2, window_bounds = array<i64: 128, 128>}, {transform_indices = @transform_3, window_bounds = array<i64: 128, 128>}]} {
    %c0_i32 = arith.constant 0 : i32
    %0 = arith.cmpi eq, %arg1, %c0_i32 : i32
    %1 = arith.extui %0 : i1 to i32
    %c0_i32_0 = arith.constant 0 : i32
    %2 = arith.cmpi ne, %1, %c0_i32_0 : i32
    scf.if %2 {
      %cst_9 = arith.constant 0.000000e+00 : f32
      %15 = vector.broadcast %cst_9 : f32 to vector<128x128xf32>
      %c0_10 = arith.constant 0 : index
      %c0_11 = arith.constant 0 : index
      %16 = vector.load %arg6[%c0_10, %c0_11] : memref<128x128xf32, #tpu.memory_space<vmem>>, vector<128x128xf32>
      tpu.vector_store %arg6[%c0_10, %c0_11], %15 {strides = array<i32>} : memref<128x128xf32, #tpu.memory_space<vmem>>, vector<128x128xf32>,
    } else {
    }
    %c256_i32 = arith.constant 256 : i32
    %3 = arith.muli %arg1, %c256_i32 : i32
    %4 = tpu.assume_multiple %3, 256 : i32
    %5 = arith.index_cast %4 : i32 to index
    %c0 = arith.constant 0 : index
    %6 = vector.load %arg3[%5, %c0] : memref<256x128xbf16, #tpu.memory_space<vmem>>, vector<256x128xbf16>
    %c0_1 = arith.constant 0 : index
    %c0_2 = arith.constant 0 : index
    %7 = vector.load %arg6[%c0_1, %c0_2] : memref<128x128xf32, #tpu.memory_space<vmem>>, vector<128x128xf32>
    %c0_3 = arith.constant 0 : index
    %c0_4 = arith.constant 0 : index
    %8 = vector.load %arg2[%c0_3, %c0_4] : memref<128x256xbf16, #tpu.memory_space<vmem>>, vector<128x256xbf16>
    %cst = arith.constant dense<0.000000e+00> : vector<128x128xf32>
    %9 = tpu.matmul %8, %6, %cst {dimension_numbers = #tpu.dot_dimension_numbers<[1], [0], [0], [1], [0, 0, 1, 1], [], []>} : vector<128x256xbf16>, vector<256x128xbf16>, vector<128x128xf32> -> vector<128x128xf32>
    %10 = arith.addf %7, %9 : vector<128x128xf32>
    %c0_5 = arith.constant 0 : index
    %c0_6 = arith.constant 0 : index
    %11 = vector.load %arg6[%c0_5, %c0_6] : memref<128x128xf32, #tpu.memory_space<vmem>>, vector<128x128xf32>
    tpu.vector_store %arg6[%c0_5, %c0_6], %10 {strides = array<i32>} : memref<128x128xf32, #tpu.memory_space<vmem>>, vector<128x128xf32>,
    %c0_i32_7 = arith.constant 0 : i32
    %12 = arith.cmpi eq, %arg1, %c0_i32_7 : i32
    %13 = arith.extui %12 : i1 to i32
    %c0_i32_8 = arith.constant 0 : i32
    %14 = arith.cmpi ne, %13, %c0_i32_8 : i32
    scf.if %14 {
      %c0_9 = arith.constant 0 : index
      %c0_10 = arith.constant 0 : index
      %15 = vector.load %arg6[%c0_9, %c0_10] : memref<128x128xf32, #tpu.memory_space<vmem>>, vector<128x128xf32>
      %c0_11 = arith.constant 0 : index
      %c0_12 = arith.constant 0 : index
      %16 = vector.load %arg4[%c0_11, %c0_12] : memref<128x128xf32, #tpu.memory_space<vmem>>, vector<128x128xf32>
      %17 = arith.addf %15, %16 : vector<128x128xf32>
      %cst_13 = arith.constant 0.000000e+00 : f32
      %18 = vector.broadcast %cst_13 : f32 to vector<128x128xf32>
      %19 = arith.maximumf %17, %18 : vector<128x128xf32>
      %20 = arith.truncf %19 : vector<128x128xf32> to vector<128x128xbf16>
      %c0_14 = arith.constant 0 : index
      %c0_15 = arith.constant 0 : index
      %21 = vector.load %arg5[%c0_14, %c0_15] : memref<128x128xbf16, #tpu.memory_space<vmem>>, vector<128x128xbf16>
      tpu.vector_store %arg5[%c0_14, %c0_15], %20 {strides = array<i32>} : memref<128x128xbf16, #tpu.memory_space<vmem>>, vector<128x128xbf16>,
    } else {
    }
    return
  }
  func.func @transform_0(%arg0: i32, %arg1: i32) -> (i32, i32) {
    %c0_i32 = arith.constant 0 : i32
    return %arg0, %arg1 : i32, i32
  }
  func.func @transform_1(%arg0: i32, %arg1: i32) -> (i32, i32) {
    %c0_i32 = arith.constant 0 : i32
    %c0_i32_0 = arith.constant 0 : i32
    %c0_i32_1 = arith.constant 0 : i32
    return %c0_i32, %c0_i32_0 : i32, i32
  }
  func.func @transform_2(%arg0: i32, %arg1: i32) -> (i32, i32) {
    %c0_i32 = arith.constant 0 : i32
    %c0_i32_0 = arith.constant 0 : i32
    return %arg0, %c0_i32 : i32, i32
  }
  func.func @transform_3(%arg0: i32, %arg1: i32) -> (i32, i32) {
    %c0_i32 = arith.constant 0 : i32
    %c0_i32_0 = arith.constant 0 : i32
    return %arg0, %c0_i32 : i32, i32
  }
}

</mosaic_0001>

<bundles_post_ra>
// kernel: tpu_custom_call.1
= control target key start
LH: loop header
LB: loop body
LE: loop exit
PB: predicated region body
PF: predicated region fallthrough
CT: control target
= control target key end

     0   :  { %8 = vsyncpa [#allocation4], 0  ;;  %s1669_s0 = inlined_call_operand.hbm [shape: bf16[256,256], index: 0, kind: input, shape index: {}]   ;;  %s1670_s1 = inlined_call_operand.hbm [shape: bf16[256,128], index: 1, kind: input, shape index: {}]   ;;  %s1671_s2 = inlined_call_operand.hbm [shape: f32[256,128], index: 2, kind: input, shape index: {}]   ;;  %s1672_s3 = inlined_call_operand.hbm [shape: bf16[256,128], index: 3, kind: output, shape index: {}]  }
   0x1   :  { %10 = vsyncpa [#allocation4 + $0x1], 0 }
   0x2   :  { %11 = vsyncpa [#allocation7], 0 }
   0x3   :  { %12 = vsyncpa [#allocation5], 0 }
   0x4   :  { %14 = vsyncpa [#allocation5 + $0x1], 0  ;;  %s1436_s12 = smov 0   ;;  %s1438_s13 = smov 0  }
   0x5   :  { %s1440_s14 = smov 0   ;;  %s1442_s15 = smov 0  }
   0x6   :  { %s1444_s16 = smov 0   ;;  %s1446_s17 = smov 0  }
   0x7 LB: > { %s32_s18 = sadd.s32 1, %s1403_s16  ;;  %s41_s19 = sadd.s32 1, %s1395_s14  ;;  %s1407_s17 = sphi %s1446_s17, %s20_s17   ;;  %s1403_s16 = sphi %s1444_s16, %s1682_s16   ;;  %s1399_s15 = sphi %s1442_s15, %s1681_s15   ;;  %s1395_s14 = sphi %s1440_s14, %s1680_s14   ;;  %s1391_s13 = sphi %s1438_s13, %s1679_s13   ;;  %s1387_s12 = sphi %s1436_s12, %s1678_s12  }
   0x8   : > { %p34_p0 = scmp.ge.s32.totalorder %s32_s18, 2  ;;  %p48_p1 = scmp.ne.s32.totalorder %s1395_s14, %s1391_s13 }
   0x9   : > { %p49_p2 = scmp.eq.s32.totalorder %s1407_s17, 0  ;;  %p898_p3 = scmp.ge.s32.totalorder %s1407_s17, 2 }
   0xa   : > { %s1684_s18 = smov (%p34_p0, %s32_s18), 0  ;;  %p1169_p5 = scmp.lt.s32.totalorder %s1407_s17, 2 }
   0xb   : > { %p1477_p4 = por %p49_p2, %p48_p1  ;;  %s36_s21 = ssub.s32 %s1403_s16, %s1684_s18 }
   0xc   : > { %s165_s22 = sand.u32 1, %s1407_s17   ;;  %p39_p6 = scmp.eq.s32.totalorder %s36_s21, 0 }
   0xd   : > { %s167_s23 = sand.u32 1, %s1395_s14   ;;  %s1045_s24 = sshll.u32 %s1403_s16, 7 }
   0xe   : > { %s1488_s25 = scalar_select %p39_p6, %s1395_s14, %s41_s19  }
   0xf   : > { %s899_s26 = sshll.u32 %s167_s23, 7  ;;  %s177_s29 = scalar_lea.hbm %s1669_s0, %s1045_s24 }
  0x10   : > { %s178_s30 = sshll.u32 %s177_s29, 4  ;;  %s169_s4 = scalar_lea.vmem [#allocation3], %s899_s26  ;;  %s179_s30 = int_to_ptr.hbm [resolvable:$true] %s178_s30 }
  0x11   : > { %s180_s5 = sshll.u32 %s169_s4, 4  ;;  %p1497_p7 = pnand %p1169_p5, %p1477_p4  ;;  %s181_s5 = int_to_ptr.vmem [resolvable:$true] %s180_s5 }
  0x12   : > { %s1501_s7 = scalar_lea.sflag [#allocation4], %s165_s22  ;;  %s1409_s8 = smov 128  }
  0x13   : > { %s1410_s9 = smov 8   ;;  %s199_s19 = scalar_lea.hbm %s1671_s2, %s1045_s24 }
  0x14   : > { %1160 = dma.hbm_to_vmem [thread:$0]  (!%p1497_p7), %s179_s30, 2048, %s181_s5, %s1501_s7, %s1409_s8, %s1409_s8, %s1410_s9  }
  0x15   : > { %s194_s20 = scalar_lea.vmem [#allocation8], %s899_s26  ;;  %s200_s23 = sshll.u32 %s199_s19, 4  ;;  %s201_s23 = int_to_ptr.hbm [resolvable:$true] %s200_s23 }
  0x16   : > { %s202_s21 = sshll.u32 %s194_s20, 4  ;;  %s1513_s22 = sadd.s32 4294967295, %s1407_s17   ;;  %s203_s21 = int_to_ptr.vmem [resolvable:$true] %s202_s21 }
  0x17   : > { %s895_s27 = sadd.s32 4294967294, %s1407_s17   ;;  %p54_p8 = scmp.ne.s32.totalorder %s1391_s13, %s1387_s12 }
  0x18   : > { %p55_p9 = scmp.eq.s32.totalorder %s1513_s22, 0  ;;  %p125_p10 = scmp.eq.s32.totalorder %s1513_s22, 1 }
  0x19   : > { %p131_p11 = scmp.eq.s32.totalorder %s895_s27, 1  ;;  %p896_p12 = scmp.ge.s32.totalorder %s1407_s17, 1 }
  0x1a   : > { %p1523_p13 = por %p55_p9, %p54_p8  ;;  %p1530_p0 = por %p125_p10, %p48_p1 }
  0x1b   : > { %p1534_p2 = por %p131_p11, %p54_p8  ;;  %p138_p4 = scmp.lt.s32.totalorder %s1407_s17, 3 }
  0x1c   : > { %s149_s4 = sshll.u32 %s1670_s1, 4  ;;  %s1411_s5 = smov [#allocation6]   ;;  %s150_s4 = int_to_ptr.hbm [resolvable:$true] %s149_s4 }
  0x1d   : > { %p139_p5 = pnand %p896_p12, %p138_p4  ;;  %s151_s10 = sshll.u32 %s1411_s5, 4  ;;  %s152_s10 = int_to_ptr.vmem [resolvable:$true] %s151_s10 }
  0x1e   : > { %1163 = dma.hbm_to_vmem [thread:$0]  (!%p1497_p7), %s201_s23, 2048, %s203_s21, %s1501_s7, %s1409_s8, %s1409_s8, %s1410_s9  }
  0x1f   : > { %p1153_p6 = pneg %p139_p5  ;;  %s1412_s11 = smov 64  }
  0x20   : > { %s1413_s19 = smov 4   ;;  %214 = sbr.rel (%p139_p5) target bundleno = 276 (0x114), region = 32 }
  0x21   : > { %p1154_p1 = pnand %p1153_p6, %p55_p9  ;;  %s216_s20 = sand.u32 (!%p139_p5), 1, %s1513_s22  }
  0x22   : > { %s1552_s27 = sand.u32 (!%p139_p5), 1, %s1391_s13   ;;  %s217_s30 = scalar_lea.sflag (!%p139_p5), [#allocation4], %s216_s20 }
  0x23   : > { %1156 = dma.hbm_to_vmem [thread:$0]  (!%p1154_p1), %s150_s4, 2048, %s152_s10, [#allocation7], %s1412_s11, %s1412_s11, %s1413_s19  }
  0x24   : > { %s907_s29 = sshll.u32 (!%p139_p5), %s1552_s27, 7 }
  0x25   : > { %s1555_s5 = scalar_lea.vmem [#allocation3], %s907_s29 }
  0x26   : > { %1370 = dma.done.wait (%p1523_p13), %s217_s30, 2048  }
  0x27   : > { %1372 = vsyncadd (%p1523_p13), %s217_s30, 4294965248 }
  0x28   : > { %1374 = dma.done.wait (%p55_p9), [#allocation7], 2048  }
  0x29   : > { %1376 = vsyncadd (%p55_p9), [#allocation7], 4294965248  ;;  %s1565_s6 = scalar_lea.vmem [#allocation8], %s907_s29 }
  0x2a   : > { %1378 = dma.done.wait (%p1523_p13), %s217_s30, 2048  }
  0x2b   : > { %1380 = vsyncadd (%p1523_p13), %s217_s30, 4294965248  ;;  %v1054_v0 = vld [vmem:[#allocation6 + $0x38] sm:$0xff]  ;;  %v1053_v2 = vld [vmem:[#allocation6 + $0x30] sm:$0xff]  ;;  %s910_s7 = sshll.u32 %s1552_s27, 6  ;;  %s1079_s9 = sshll.u32 %s1399_s15, 6 }
  0x2c   : > { %v1062_v1 = vld [vmem:[#allocation6 + $0x78] sm:$0xff]  ;;  %533 = vmatpush.bf16.msra.mxu0 %v1054_v0  ;;  %1127 = vmatpush.bf16.msra.mxu2 %v1054_v0  ;;  %v1061_v3 = vld [vmem:[#allocation6 + $0x70] sm:$0xff]  ;;  %v1052_v4 = vld [vmem:[#allocation6 + $0x28] sm:$0xff]  ;;  %s1608_s8 = scalar_lea.vmem [#allocation9], %s910_s7  ;;  %s774_s22 = scalar_lea.hbm %s1672_s3, %s1079_s9 }
  0x2d   : > { %582 = vmatpush.bf16.msra.mxu1 %v1062_v1  ;;  %1135 = vmatpush.bf16.msra.mxu3 %v1062_v1  ;;  %v1060_v5 = vld [vmem:[#allocation6 + $0x68] sm:$0xff]  ;;  %v1051_v6 = vld [vmem:[#allocation6 + $0x20] sm:$0xff]  ;;  %v1050_v8 = vld [vmem:[#allocation6 + $0x18] sm:$0xff]  ;;  %s775_s24 = sshll.u32 %s1608_s8, 4  ;;  %s777_s15 = sshll.u32 %s774_s22, 4  ;;  %s776_s24 = int_to_ptr.vmem [resolvable:$true] %s775_s24  ;;  %s778_s15 = int_to_ptr.hbm [resolvable:$true] %s777_s15 }
  0x2e   : > { %v1059_v7 = vld [vmem:[#allocation6 + $0x60] sm:$0xff]  ;;  %v1058_v9 = vld [vmem:[#allocation6 + $0x58] sm:$0xff]  ;;  %v1049_v10 = vld [vmem:[#allocation6 + $0x10] sm:$0xff]  ;;  %s763_s4 = scalar_lea.sflag [#allocation5], %s1552_s27  ;;  %s1331_s10 = sshra.s32 %s778_s15, 4  ;;  %s1332_s10 = int_to_ptr.hbm [resolvable:$true] %s1331_s10 }
  0x2f   : > { %v1057_v11 = vld [vmem:[#allocation6 + $0x50] sm:$0xff]  ;;  %v1048_v12 = vld [vmem:[#allocation6 + $0x8] sm:$0xff]  ;;  %v1047_v14 = vld [vmem:[#allocation6] sm:$0xff]  ;;  %s1333_s11 = scalar_lea.hbm %s1332_s10, 64  ;;  %s1337_s29 = scalar_lea.hbm %s1672_s3, 128 }
  0x30   : > { %534 = vmatpush.bf16.msra.mxu0 %v1053_v2  ;;  %1128 = vmatpush.bf16.msra.mxu2 %v1053_v2  ;;  %v1056_v13 = vld [vmem:[#allocation6 + $0x48] sm:$0xff]  ;;  %v1055_v15 = vld [vmem:[#allocation6 + $0x40] sm:$0xff]  ;;  %v921_v28 = vld [vmem:[%s1555_s5 + $0x10] sm:$0xf]  ;;  %p1334_p7 = scmp.ne.s32.totalorder %s1332_s10, %s1333_s11  ;;  %p1338_p10 = scmp.lt.s32.totalorder %s1332_s10, %s1672_s3 }
  0x31   : > { %583 = vmatpush.bf16.msra.mxu1 %v1061_v3  ;;  %1136 = vmatpush.bf16.msra.mxu3 %v1061_v3  ;;  %v913_v16 = vld [vmem:[%s1555_s5] sm:$0xf]  ;;  %v1064_v17 = vld [vmem:[%s1555_s5 + $0x4] sm:$0xf0]  ;;  %v1063_v20 = vld [vmem:[%s1555_s5 + $0x4] sm:$0xf]  ;;  %p1339_p11 = scmp.lt.s32.totalorder %s1337_s29, %s1333_s11 }
  0x32   : > { %v945_v18 = vld [vmem:[%s1555_s5 + $0x40] sm:$0xf]  ;;  %v1072_v19 = vld [vmem:[%s1555_s5 + $0x44] sm:$0xf0]  ;;  %v915_v21 = vld [vmem:[%s1555_s5 + $0x8] sm:$0xf0]  ;;  %v914_v24 = vor.u32 %v1064_v17, %v913_v16  ;;  %p1335_p8 = pnand %p1334_p7, %p1530_p0 }
  0x33   : > { %v1071_v22 = vld [vmem:[%s1555_s5 + $0x44] sm:$0xf]  ;;  %v947_v23 = vld [vmem:[%s1555_s5 + $0x48] sm:$0xf0]  ;;  %v946_v25 = vor.u32 %v1072_v19, %v945_v18  ;;  %v918_v26 = vor.u32 %v1063_v20, %v915_v21  ;;  %v1066_v29 = vld [vmem:[%s1555_s5 + $0x14] sm:$0xf0]  ;;  %p1340_p12 = por %p1339_p11, %p1338_p10 }
  0x34   : > { %535 = vmatpush.bf16.msra.mxu0 %v1052_v4  ;;  %1129 = vmatpush.bf16.msra.mxu2 %v1052_v4  ;;  %v950_v27 = vor.u32 %v1071_v22, %v947_v23  ;;  %v953_v30 = vld [vmem:[%s1555_s5 + $0x50] sm:$0xf]  ;;  %v1074_v31 = vld [vmem:[%s1555_s5 + $0x54] sm:$0xf0]  ;;  %v1065_v32 = vld [vmem:[%s1555_s5 + $0x14] sm:$0xf]  ;;  %v922_v36 = vor.u32 %v1066_v29, %v921_v28  ;;  %p1336_p9 = pneg %p1335_p8 }
  0x35   : > { %584 = vmatpush.bf16.msra.mxu1 %v1060_v5  ;;  %1137 = vmatpush.bf16.msra.mxu3 %v1060_v5  ;;  %v923_v33 = vld [vmem:[%s1555_s5 + $0x18] sm:$0xf0]  ;;  %v1073_v34 = vld [vmem:[%s1555_s5 + $0x54] sm:$0xf]  ;;  %v954_v37 = vor.u32 %v1074_v31, %v953_v30  ;;  %v929_v40 = vld [vmem:[%s1555_s5 + $0x20] sm:$0xf] }
  0x36   : > { %v955_v35 = vld [vmem:[%s1555_s5 + $0x58] sm:$0xf0]  ;;  %v926_v38 = vor.u32 %v1065_v32, %v923_v33  ;;  %v1068_v41 = vld [vmem:[%s1555_s5 + $0x24] sm:$0xf0]  ;;  %v961_v42 = vld [vmem:[%s1555_s5 + $0x60] sm:$0xf]  ;;  %p1341_p13 = pnand %p1340_p12, %p1336_p9 }
  0x37   : > { %v958_v39 = vor.u32 %v1073_v34, %v955_v35  ;;  %v1076_v43 = vld [vmem:[%s1555_s5 + $0x64] sm:$0xf0]  ;;  %v1067_v44 = vld [vmem:[%s1555_s5 + $0x24] sm:$0xf]  ;;  %v931_v45 = vld [vmem:[%s1555_s5 + $0x28] sm:$0xf0]  ;;  %v930_v48 = vor.u32 %v1068_v41, %v929_v40 }
  0x38   : > { %536 = vmatpush.bf16.msra.mxu0 %v1051_v6  ;;  %1130 = vmatpush.bf16.msra.mxu2 %v1051_v6  ;;  %v1075_v46 = vld [vmem:[%s1555_s5 + $0x64] sm:$0xf]  ;;  %v963_v47 = vld [vmem:[%s1555_s5 + $0x68] sm:$0xf0]  ;;  %v962_v49 = vor.u32 %v1076_v43, %v961_v42  ;;  %v934_v50 = vor.u32 %v1067_v44, %v931_v45  ;;  %v937_v52 = vld [vmem:[%s1555_s5 + $0x30] sm:$0xf] }
  0x39   : > { %585 = vmatpush.bf16.msra.mxu1 %v1059_v7  ;;  %1138 = vmatpush.bf16.msra.mxu3 %v1059_v7  ;;  %v966_v51 = vor.u32 %v1075_v46, %v963_v47  ;;  %v1070_v53 = vld [vmem:[%s1555_s5 + $0x34] sm:$0xf0]  ;;  %v969_v54 = vld [vmem:[%s1555_s5 + $0x70] sm:$0xf]  ;;  %v1069_v56 = vld [vmem:[%s1555_s5 + $0x34] sm:$0xf] }
  0x3a   : > { %v1078_v55 = vld [vmem:[%s1555_s5 + $0x74] sm:$0xf0]  ;;  %v939_v57 = vld [vmem:[%s1555_s5 + $0x38] sm:$0xf0]  ;;  %v1077_v58 = vld [vmem:[%s1555_s5 + $0x74] sm:$0xf]  ;;  %v938_v60 = vor.u32 %v1070_v53, %v937_v52 }
  0x3b   : > { %v971_v59 = vld [vmem:[%s1555_s5 + $0x78] sm:$0xf0]  ;;  %v970_v61 = vor.u32 %v1078_v55, %v969_v54  ;;  %v942_v62 = vor.u32 %v1069_v56, %v939_v57  ;;  %v682_v4 = vld [vmem:[%s1565_s6] sm:$0xff]  ;;  %v691_v18 = vld [vmem:[%s1565_s6 + $0x48] sm:$0xff] }
  0x3c   : > { %537 = vmatpush.bf16.msra.mxu0 %v1050_v8  ;;  %1131 = vmatpush.bf16.msra.mxu2 %v1050_v8  ;;  %v974_v63 = vor.u32 %v1077_v58, %v971_v59  ;;  %v683_v8 = vld [vmem:[%s1565_s6 + $0x8] sm:$0xff]  ;;  %v684_v30 = vld [vmem:[%s1565_s6 + $0x10] sm:$0xff]  ;;  %v685_v34 = vld [vmem:[%s1565_s6 + $0x18] sm:$0xff] }
  0x3d   : > { %586 = vmatpush.bf16.msra.mxu1 %v1058_v9  ;;  %1139 = vmatpush.bf16.msra.mxu3 %v1058_v9  ;;  %v693_v44 = vld [vmem:[%s1565_s6 + $0x58] sm:$0xff]  ;;  %v686_v56 = vld [vmem:[%s1565_s6 + $0x20] sm:$0xff] }
  0x40   : > { %538 = vmatpush.bf16.msra.mxu0 %v1049_v10  ;;  %1132 = vmatpush.bf16.msra.mxu2 %v1049_v10 }
  0x41   : > { %587 = vmatpush.bf16.msra.mxu1 %v1057_v11  ;;  %1140 = vmatpush.bf16.msra.mxu3 %v1057_v11 }
  0x44   : > { %539 = vmatpush.bf16.msra.mxu0 %v1048_v12  ;;  %1133 = vmatpush.bf16.msra.mxu2 %v1048_v12 }
  0x45   : > { %588 = vmatpush.bf16.msra.mxu1 %v1056_v13  ;;  %1141 = vmatpush.bf16.msra.mxu3 %v1056_v13  ;;  %v690_v13 = vld [vmem:[%s1565_s6 + $0x40] sm:$0xff] }
  0x48   : > { %540 = vmatpush.bf16.msra.mxu0 %v1047_v14  ;;  %1134 = vmatpush.bf16.msra.mxu2 %v1047_v14 }
  0x49   : > { %589 = vmatpush.bf16.msra.mxu1 %v1055_v15  ;;  %1142 = vmatpush.bf16.msra.mxu3 %v1055_v15 }
  0x4b   : > { %541 = vmatmul.bf16.vlgmr.msra.gmra.mxu0 %v914_v24  ;;  %561 = vmatmul.bf16.vlgmr.msra.gmra.mxu2 %v946_v25 }
  0x4c   : > { %590 = vmatmul.bf16.vlgmr.msra.gmra.mxu1 %v918_v26  ;;  %610 = vmatmul.bf16.vlgmr.msra.gmra.mxu3 %v950_v27 }
  0x5b   : > { %546 = vmatmul.bf16.gmra.mxu0 %v922_v36  ;;  %566 = vmatmul.bf16.gmra.mxu2 %v954_v37 }
  0x5c   : > { %595 = vmatmul.bf16.gmra.mxu1 %v926_v38  ;;  %615 = vmatmul.bf16.gmra.mxu3 %v958_v39  ;;  %v692_v39 = vld [vmem:[%s1565_s6 + $0x50] sm:$0xff] }
  0x6b   : > { %551 = vmatmul.bf16.gmra.mxu0 %v930_v48  ;;  %571 = vmatmul.bf16.gmra.mxu2 %v962_v49 }
  0x6c   : > { %600 = vmatmul.bf16.gmra.mxu1 %v934_v50  ;;  %620 = vmatmul.bf16.gmra.mxu3 %v966_v51 }
  0x7b   : > { %556 = vmatmul.bf16.gmra.mxu0 %v938_v60  ;;  %576 = vmatmul.bf16.gmra.mxu2 %v970_v61  ;;  %v687_v60 = vld [vmem:[%s1565_s6 + $0x28] sm:$0xff] }
  0x7c   : > { %605 = vmatmul.bf16.gmra.mxu1 %v942_v62  ;;  %625 = vmatmul.bf16.gmra.mxu3 %v974_v63 }
  0xc8   : > { %v542_v0 = vpop.f32.mrf.mxu0 }
  0xc9   : > { %v591_v1 = vpop.f32.mrf.mxu1 }
  0xca   : > { %v592_v2 = vadd.f32 %v591_v1, %v542_v0  ;;  %v694_v1 = vld [vmem:[%s1565_s6 + $0x60] sm:$0xff] }
  0xcc   : > { %v698_v9 = vadd.f32 %v682_v4, %v592_v2 }
  0xce   : > { %v562_v3 = vpop.f32.mrf.mxu2  ;;  %v714_v14 = vmax.f32 %v698_v9, 0.0 }
  0xcf   : > { %v611_v5 = vpop.f32.mrf.mxu3 }
  0xd0   : > { %v544_v6 = vpop.f32.mrf.mxu0  ;;  %v612_v11 = vadd.f32 %v611_v5, %v562_v3 }
  0xd1   : > { %v593_v7 = vpop.f32.mrf.mxu1 }
  0xd2   : > { %v594_v10 = vadd.f32 %v593_v7, %v544_v6  ;;  %v706_v19 = vadd.f32 %v690_v13, %v612_v11  ;;  %v695_v6 = vld [vmem:[%s1565_s6 + $0x68] sm:$0xff] }
  0xd4   : > { %v699_v12 = vadd.f32 %v683_v8, %v594_v10  ;;  %v722_v25 = vmax.f32 %v706_v19, 0.0 }
  0xd6   : > { %v715_v15 = vmax.f32 %v699_v12, 0.0  ;;  %v564_v16 = vpop.f32.mrf.mxu2 }
  0xd7   : > { %v613_v17 = vpop.f32.mrf.mxu3 }
  0xd8   : > { %v1083_v20 = vpack.c.bf16 %v715_v15, %v714_v14  ;;  %v614_v21 = vadd.f32 %v613_v17, %v564_v16  ;;  %v547_v22 = vpop.f32.mrf.mxu0 }
  0xd9   : > { %v596_v23 = vpop.f32.mrf.mxu1 }
  0xda   : > { %1084 = vst [vmem:[%s1608_s8] sm:$0xff] %v1083_v20   ;;  %v707_v24 = vadd.f32 %v691_v18, %v614_v21  ;;  %v597_v28 = vadd.f32 %v596_v23, %v547_v22  ;;  %v688_v18 = vld [vmem:[%s1565_s6 + $0x30] sm:$0xff]  ;;  %v689_v22 = vld [vmem:[%s1565_s6 + $0x38] sm:$0xff] }
  0xdc   : > { %v723_v26 = vmax.f32 %v707_v24, 0.0  ;;  %v700_v35 = vadd.f32 %v684_v30, %v597_v28 }
  0xde   : > { %v1103_v27 = vpack.c.bf16 %v723_v26, %v722_v25  ;;  %v567_v29 = vpop.f32.mrf.mxu2  ;;  %v716_v40 = vmax.f32 %v700_v35, 0.0 }
  0xdf   : > { %v616_v31 = vpop.f32.mrf.mxu3 }
  0xe0   : > { %1123 = vst [vmem:[%s1608_s8 + $0x20] sm:$0xff] %v1103_v27   ;;  %v549_v32 = vpop.f32.mrf.mxu0  ;;  %v617_v37 = vadd.f32 %v616_v31, %v567_v29  ;;  %v696_v27 = vld [vmem:[%s1565_s6 + $0x70] sm:$0xff] }
  0xe1   : > { %v598_v33 = vpop.f32.mrf.mxu1 }
  0xe2   : > { %v599_v36 = vadd.f32 %v598_v33, %v549_v32  ;;  %v708_v45 = vadd.f32 %v692_v39, %v617_v37  ;;  %v697_v32 = vld [vmem:[%s1565_s6 + $0x78] sm:$0xff] }
  0xe4   : > { %v701_v38 = vadd.f32 %v685_v34, %v599_v36  ;;  %v724_v51 = vmax.f32 %v708_v45, 0.0 }
  0xe6   : > { %v717_v41 = vmax.f32 %v701_v38, 0.0  ;;  %v569_v42 = vpop.f32.mrf.mxu2 }
  0xe7   : > { %v618_v43 = vpop.f32.mrf.mxu3 }
  0xe8   : > { %v1088_v46 = vpack.c.bf16 %v717_v41, %v716_v40  ;;  %v619_v47 = vadd.f32 %v618_v43, %v569_v42  ;;  %v552_v48 = vpop.f32.mrf.mxu0 }
  0xe9   : > { %v601_v49 = vpop.f32.mrf.mxu1 }
  0xea   : > { %1120 = vst [vmem:[%s1608_s8 + $0x8] sm:$0xff] %v1088_v46   ;;  %v709_v50 = vadd.f32 %v693_v44, %v619_v47  ;;  %v602_v54 = vadd.f32 %v601_v49, %v552_v48 }
  0xec   : > { %v725_v52 = vmax.f32 %v709_v50, 0.0  ;;  %v702_v61 = vadd.f32 %v686_v56, %v602_v54 }
  0xee   : > { %v1108_v53 = vpack.c.bf16 %v725_v52, %v724_v51  ;;  %v572_v55 = vpop.f32.mrf.mxu2  ;;  %v718_v2 = vmax.f32 %v702_v61, 0.0 }
  0xef   : > { %v621_v57 = vpop.f32.mrf.mxu3 }
  0xf0   : > { %1124 = vst [vmem:[%s1608_s8 + $0x28] sm:$0xff] %v1108_v53   ;;  %v554_v58 = vpop.f32.mrf.mxu0  ;;  %v622_v63 = vadd.f32 %v621_v57, %v572_v55 }
  0xf1   : > { %v603_v59 = vpop.f32.mrf.mxu1 }
  0xf2   : > { %v604_v62 = vadd.f32 %v603_v59, %v554_v58  ;;  %v710_v7 = vadd.f32 %v694_v1, %v622_v63 }
  0xf4   : > { %v703_v0 = vadd.f32 %v687_v60, %v604_v62  ;;  %v726_v13 = vmax.f32 %v710_v7, 0.0 }
  0xf6   : > { %v719_v3 = vmax.f32 %v703_v0, 0.0  ;;  %v574_v4 = vpop.f32.mrf.mxu2 }
  0xf7   : > { %v623_v5 = vpop.f32.mrf.mxu3 }
  0xf8   : > { %v1093_v8 = vpack.c.bf16 %v719_v3, %v718_v2  ;;  %v624_v9 = vadd.f32 %v623_v5, %v574_v4  ;;  %v557_v10 = vpop.f32.mrf.mxu0 }
  0xf9   : > { %v606_v11 = vpop.f32.mrf.mxu1 }
  0xfa   : > { %1121 = vst [vmem:[%s1608_s8 + $0x10] sm:$0xff] %v1093_v8   ;;  %v711_v12 = vadd.f32 %v695_v6, %v624_v9  ;;  %v607_v16 = vadd.f32 %v606_v11, %v557_v10 }
  0xfc   : > { %v727_v14 = vmax.f32 %v711_v12, 0.0  ;;  %v704_v23 = vadd.f32 %v688_v18, %v607_v16 }
  0xfe   : > { %v1113_v15 = vpack.c.bf16 %v727_v14, %v726_v13  ;;  %v577_v17 = vpop.f32.mrf.mxu2  ;;  %v720_v28 = vmax.f32 %v704_v23, 0.0 }
  0xff   : > { %v626_v19 = vpop.f32.mrf.mxu3 }
 0x100   : > { %1125 = vst [vmem:[%s1608_s8 + $0x30] sm:$0xff] %v1113_v15   ;;  %v559_v20 = vpop.f32.mrf.mxu0  ;;  %v627_v25 = vadd.f32 %v626_v19, %v577_v17 }
 0x101   : > { %v608_v21 = vpop.f32.mrf.mxu1 }
 0x102   : > { %v609_v24 = vadd.f32 %v608_v21, %v559_v20  ;;  %v712_v33 = vadd.f32 %v696_v27, %v627_v25 }
 0x104   : > { %v705_v26 = vadd.f32 %v689_v22, %v609_v24  ;;  %v728_v37 = vmax.f32 %v712_v33, 0.0 }
 0x106   : > { %v721_v29 = vmax.f32 %v705_v26, 0.0  ;;  %v579_v30 = vpop.f32.mrf.mxu2 }
 0x107   : > { %v628_v31 = vpop.f32.mrf.mxu3 }
 0x108   : > { %v1098_v34 = vpack.c.bf16 %v721_v29, %v720_v28  ;;  %v629_v35 = vadd.f32 %v628_v31, %v579_v30 }
 0x10a   : > { %1122 = vst [vmem:[%s1608_s8 + $0x18] sm:$0xff] %v1098_v34   ;;  %v713_v36 = vadd.f32 %v697_v32, %v629_v35 }
 0x10c   : > { %v729_v38 = vmax.f32 %v713_v36, 0.0 }
 0x10e   : > { %v1118_v39 = vpack.c.bf16 %v729_v38, %v728_v37 }
 0x110   : > { %1126 = vst [vmem:[%s1608_s8 + $0x38] sm:$0xff] %v1118_v39  }
 0x111   : > { %1344 = shalt.err (!%p1341_p13)
}
 0x112   : > { %s1414_s27 = smov 64   ;;  %s1415_s6 = smov 4  }
 0x113   : > { %1151 = dma.vmem_to_hbm [thread:$0]  (%p1530_p0), %s776_s24, 1024, %s778_s15, %s763_s4, %s1414_s27, %s1414_s27, %s1415_s6  }
 0x114 PF: > { %s792_s7 = sand.u32 1, %s1387_s12   ;;  %p1165_p4 = pnand %p898_p3, %p1534_p2 }
 0x115   : > { %s793_s8 = scalar_lea.sflag [#allocation5], %s792_s7 }
 0x116   : > { %p1166_p5 = pneg %p1165_p4 }
 0x118   : > { %1382 = dma.done.wait (%p1166_p5), %s793_s8, 1024  }
 0x119   : > { %1384 = vsyncadd (%p1166_p5), %s793_s8, 4294966272  ;;  %s20_s17 = sadd.s32 1, %s1407_s17   ;;  %s1678_s12 = smov %s1391_s13 }
 0x11a   : > { %p17_p6 = scmp.ge.s32.totalorder %s20_s17, 4   ;;  %s1679_s13 = smov %s1395_s14 }
 0x11b   : > { %s1680_s14 = smov %s1488_s25  ;;  %s1681_s15 = smov %s1403_s16 }
 0x11c   : > { %s1682_s16 = smov %s1684_s18  ;;  %19 = sbr.rel (!%p17_p6) target bundleno = 7 (0x7), region = 101 }
 0x121   :  { %799 = vsyncpa [#allocation4], 1 }
 0x122   :  { %801 = vsyncpa [#allocation4 + $0x1], 1 }
 0x123   :  { %802 = vsyncpa [#allocation7], 1 }
 0x124   :  { %803 = vsyncpa [#allocation5], 1 }
 0x125   :  { %805 = vsyncpa [#allocation5 + $0x1], 1 }

</bundles_post_ra>
